<compile_context>
chip_gen: v6e
topology: v6e:2x2x1
jax: 0.10.0
libtpu: 0.0.40
codegen_flags: <defaults>
</compile_context>

<pallas_src>
import jax
import jax.numpy as jnp
from jax.experimental import pallas as pl
from jax.experimental.pallas import tpu as pltpu

_LANE = 128
_SUBLANE = 8
_BLOCK_BYTES_BUDGET = 4 * 1024 * 1024  # per input block (x); output block same size


def _pa_kernel(x_ref, w_ref, b_ref, o_ref):
    # x_ref / o_ref : (1, C, BR, 128) VMEM  -- lane-dense spatial tiles
    # w_ref         : (C, C) SMEM           -- conv1x1 weight, [out, in]
    # b_ref         : (C,)   SMEM           -- bias
    n_ch = x_ref.shape[1]
    for o in range(n_ch):
        # y_o = b[o] + sum_c w[o, c] * x[c]   (scalar * slab FMAs on the VPU)
        y = b_ref[o].astype(jnp.float32)
        for c in range(n_ch):
            y = y + w_ref[o, c].astype(jnp.float32) * x_ref[0, c, :, :].astype(jnp.float32)
        att = jax.nn.sigmoid(y)                              # EUP
        x_o = x_ref[0, o, :, :].astype(jnp.float32)
        o_ref[0, o, :, :] = (x_o * att).astype(o_ref.dtype)  # unmasked lane-dense store


def _choose_block_rows(hw_rows, n_ch, itemsize):
    # Round rows up to a multiple of 8 so every VMEM tile is a full (8,128) tile.
    hw_rows8 = -(-hw_rows // _SUBLANE) * _SUBLANE
    max_rows = max(_SUBLANE,
                   (_BLOCK_BYTES_BUDGET // (n_ch * _LANE * itemsize)) // _SUBLANE * _SUBLANE)
    if hw_rows8 <= max_rows:
        return hw_rows8, 1
    block_rows = max_rows
    n_blocks = -(-hw_rows8 // block_rows)
    return block_rows, n_blocks


def pa_forward(x_nchw, weight, bias):
    """x_nchw: (N, C, H, W); weight: (C, C) conv1x1 weight (out, in); bias: (C,)."""
    N, C, H, W = x_nchw.shape
    hw = H * W
    itemsize = jnp.dtype(x_nchw.dtype).itemsize

    hw_rows = -(-hw // _LANE)
    block_rows, n_row_blocks = _choose_block_rows(hw_rows, C, itemsize)
    rows_total = block_rows * n_row_blocks
    hw_padded = rows_total * _LANE

    x3 = x_nchw.reshape(N, C, hw)
    pad = hw_padded - hw
    if pad:
        # Only pads when H*W is not a multiple of the (8*128) spatial tile.
        x3 = jnp.pad(x3, ((0, 0), (0, 0), (0, pad)))
    x4 = x3.reshape(N, C, rows_total, _LANE)

    out4 = pl.pallas_call(
        _pa_kernel,
        out_shape=jax.ShapeDtypeStruct((N, C, rows_total, _LANE), x_nchw.dtype),
        grid=(N, n_row_blocks),
        in_specs=[
            pl.BlockSpec((1, C, block_rows, _LANE), lambda n, s: (n, 0, s, 0)),
            pl.BlockSpec(memory_space=pltpu.MemorySpace.SMEM),   # weight (C, C) scalars
            pl.BlockSpec(memory_space=pltpu.MemorySpace.SMEM),   # bias (C,) scalars
        ],
        out_specs=pl.BlockSpec((1, C, block_rows, _LANE), lambda n, s: (n, 0, s, 0)),
        compiler_params=pltpu.CompilerParams(
            dimension_semantics=("parallel", "parallel"),
            vmem_limit_bytes=32 * 1024 * 1024,
        ),
    )(x4, weight, bias)

    out = out4.reshape(N, C, hw_padded)
    if pad:
        out = out[:, :, :hw]
    return out.reshape(N, C, H, W)


def pa_reference(x_nchw, weight, bias):
    # pure-JAX reference of the PyTorch module
    y = jnp.einsum('nchw,oc->nohw', x_nchw, weight) + bias[None, :, None, None]
    return x_nchw * jax.nn.sigmoid(y)


if __name__ == "__main__":
    key = jax.random.PRNGKey(0)
    N, nf, H, Wd = 2, 4, 16, 16

    kx, kw, kb = jax.random.split(key, 3)
    x = jax.random.normal(kx, (N, nf, H, Wd), dtype=jnp.float32)
    # deterministic parameter init (synthetic; mimics small uniform conv init)
    bound = 1.0 / (nf ** 0.5)
    weight = jax.random.uniform(kw, (nf, nf), minval=-bound, maxval=bound,
                                dtype=jnp.float32)   # Conv2d 1x1: (out, in)
    bias = jax.random.uniform(kb, (nf,), minval=-bound, maxval=bound,
                              dtype=jnp.float32)

    out = pa_forward(x, weight, bias)
    out = jax.block_until_ready(out)

    ref = pa_reference(x, weight, bias)
    assert out.shape == (N, nf, H, Wd)
    assert jnp.allclose(out, ref, atol=1e-5, rtol=1e-5), "mismatch vs reference"

    print("KERNEL_OK")
</pallas_src>

<mosaic_0001>
module attributes {stable_mosaic.version = 11 : i64} {
  func.func @_pa_kernel(%arg0: i32, %arg1: i32, %arg2: memref<1x4x8x128xf32, #tpu.memory_space<vmem>>, %arg3: memref<4x4xf32, #tpu.memory_space<smem>>, %arg4: memref<4xf32, #tpu.memory_space<smem>>, %arg5: memref<1x4x8x128xf32, #tpu.memory_space<vmem>>) attributes {dimension_semantics = [#tpu.dimension_semantics<parallel>, #tpu.dimension_semantics<parallel>], iteration_bounds = array<i64: 2, 1>, scalar_prefetch = 0 : i64, scratch_operands = 0 : i64, tpu.core_type = #tpu.core_type<tc>, window_params = [{transform_indices = @transform_0, window_bounds = array<i64: 1, 4, 8, 128>}, {transform_indices = @transform_1, window_bounds = array<i64: 4, 4>}, {transform_indices = @transform_2, window_bounds = array<i64: 4>}, {transform_indices = @transform_3, window_bounds = array<i64: 1, 4, 8, 128>}]} {
    %c0 = arith.constant 0 : index
    %0 = memref.load %arg4[%c0] : memref<4xf32, #tpu.memory_space<smem>>
    %c0_0 = arith.constant 0 : index
    %c0_1 = arith.constant 0 : index
    %1 = memref.load %arg3[%c0_0, %c0_1] : memref<4x4xf32, #tpu.memory_space<smem>>
    %c0_2 = arith.constant 0 : index
    %c0_3 = arith.constant 0 : index
    %c0_4 = arith.constant 0 : index
    %c0_5 = arith.constant 0 : index
    %2 = vector.load %arg2[%c0_2, %c0_3, %c0_4, %c0_5] : memref<1x4x8x128xf32, #tpu.memory_space<vmem>>, vector<1x1x8x128xf32>
    %3 = vector.shape_cast %2 : vector<1x1x8x128xf32> to vector<8x128xf32>
    %4 = vector.broadcast %1 : f32 to vector<8x128xf32>
    %5 = arith.mulf %4, %3 : vector<8x128xf32>
    %6 = vector.broadcast %0 : f32 to vector<8x128xf32>
    %7 = arith.addf %6, %5 : vector<8x128xf32>
    %c0_6 = arith.constant 0 : index
    %c1 = arith.constant 1 : index
    %8 = memref.load %arg3[%c0_6, %c1] : memref<4x4xf32, #tpu.memory_space<smem>>
    %c0_7 = arith.constant 0 : index
    %c1_8 = arith.constant 1 : index
    %c0_9 = arith.constant 0 : index
    %c0_10 = arith.constant 0 : index
    %9 = vector.load %arg2[%c0_7, %c1_8, %c0_9, %c0_10] : memref<1x4x8x128xf32, #tpu.memory_space<vmem>>, vector<1x1x8x128xf32>
    %10 = vector.shape_cast %9 : vector<1x1x8x128xf32> to vector<8x128xf32>
    %11 = vector.broadcast %8 : f32 to vector<8x128xf32>
    %12 = arith.mulf %11, %10 : vector<8x128xf32>
    %13 = arith.addf %7, %12 : vector<8x128xf32>
    %c0_11 = arith.constant 0 : index
    %c2 = arith.constant 2 : index
    %14 = memref.load %arg3[%c0_11, %c2] : memref<4x4xf32, #tpu.memory_space<smem>>
    %c0_12 = arith.constant 0 : index
    %c2_13 = arith.constant 2 : index
    %c0_14 = arith.constant 0 : index
    %c0_15 = arith.constant 0 : index
    %15 = vector.load %arg2[%c0_12, %c2_13, %c0_14, %c0_15] : memref<1x4x8x128xf32, #tpu.memory_space<vmem>>, vector<1x1x8x128xf32>
    %16 = vector.shape_cast %15 : vector<1x1x8x128xf32> to vector<8x128xf32>
    %17 = vector.broadcast %14 : f32 to vector<8x128xf32>
    %18 = arith.mulf %17, %16 : vector<8x128xf32>
    %19 = arith.addf %13, %18 : vector<8x128xf32>
    %c0_16 = arith.constant 0 : index
    %c3 = arith.constant 3 : index
    %20 = memref.load %arg3[%c0_16, %c3] : memref<4x4xf32, #tpu.memory_space<smem>>
    %c0_17 = arith.constant 0 : index
    %c3_18 = arith.constant 3 : index
    %c0_19 = arith.constant 0 : index
    %c0_20 = arith.constant 0 : index
    %21 = vector.load %arg2[%c0_17, %c3_18, %c0_19, %c0_20] : memref<1x4x8x128xf32, #tpu.memory_space<vmem>>, vector<1x1x8x128xf32>
    %22 = vector.shape_cast %21 : vector<1x1x8x128xf32> to vector<8x128xf32>
    %23 = vector.broadcast %20 : f32 to vector<8x128xf32>
    %24 = arith.mulf %23, %22 : vector<8x128xf32>
    %25 = arith.addf %19, %24 : vector<8x128xf32>
    %26 = arith.negf %25 : vector<8x128xf32>
    %27 = math.exp %26 : vector<8x128xf32>
    %cst = arith.constant 1.000000e+00 : f32
    %28 = vector.broadcast %cst : f32 to vector<8x128xf32>
    %29 = arith.addf %28, %27 : vector<8x128xf32>
    %30 = arith.divf %28, %29 : vector<8x128xf32>
    %c0_21 = arith.constant 0 : index
    %c0_22 = arith.constant 0 : index
    %c0_23 = arith.constant 0 : index
    %c0_24 = arith.constant 0 : index
    %31 = vector.load %arg2[%c0_21, %c0_22, %c0_23, %c0_24] : memref<1x4x8x128xf32, #tpu.memory_space<vmem>>, vector<1x1x8x128xf32>
    %32 = vector.shape_cast %31 : vector<1x1x8x128xf32> to vector<8x128xf32>
    %33 = arith.mulf %32, %30 : vector<8x128xf32>
    %c0_25 = arith.constant 0 : index
    %c0_26 = arith.constant 0 : index
    %c0_27 = arith.constant 0 : index
    %c0_28 = arith.constant 0 : index
    %34 = vector.load %arg5[%c0_25, %c0_26, %c0_27, %c0_28] : memref<1x4x8x128xf32, #tpu.memory_space<vmem>>, vector<1x1x8x128xf32>
    %35 = vector.shape_cast %34 : vector<1x1x8x128xf32> to vector<8x128xf32>
    %36 = vector.shape_cast %33 : vector<8x128xf32> to vector<1x1x8x128xf32>
    tpu.vector_store %arg5[%c0_25, %c0_26, %c0_27, %c0_28], %36 {strides = array<i32>} : memref<1x4x8x128xf32, #tpu.memory_space<vmem>>, vector<1x1x8x128xf32>,
    %c1_29 = arith.constant 1 : index
    %37 = memref.load %arg4[%c1_29] : memref<4xf32, #tpu.memory_space<smem>>
    %c1_30 = arith.constant 1 : index
    %c0_31 = arith.constant 0 : index
    %38 = memref.load %arg3[%c1_30, %c0_31] : memref<4x4xf32, #tpu.memory_space<smem>>
    %c0_32 = arith.constant 0 : index
    %c0_33 = arith.constant 0 : index
    %c0_34 = arith.constant 0 : index
    %c0_35 = arith.constant 0 : index
    %39 = vector.load %arg2[%c0_32, %c0_33, %c0_34, %c0_35] : memref<1x4x8x128xf32, #tpu.memory_space<vmem>>, vector<1x1x8x128xf32>
    %40 = vector.shape_cast %39 : vector<1x1x8x128xf32> to vector<8x128xf32>
    %41 = vector.broadcast %38 : f32 to vector<8x128xf32>
    %42 = arith.mulf %41, %40 : vector<8x128xf32>
    %43 = vector.broadcast %37 : f32 to vector<8x128xf32>
    %44 = arith.addf %43, %42 : vector<8x128xf32>
    %c1_36 = arith.constant 1 : index
    %c1_37 = arith.constant 1 : index
    %45 = memref.load %arg3[%c1_36, %c1_37] : memref<4x4xf32, #tpu.memory_space<smem>>
    %c0_38 = arith.constant 0 : index
    %c1_39 = arith.constant 1 : index
    %c0_40 = arith.constant 0 : index
    %c0_41 = arith.constant 0 : index
    %46 = vector.load %arg2[%c0_38, %c1_39, %c0_40, %c0_41] : memref<1x4x8x128xf32, #tpu.memory_space<vmem>>, vector<1x1x8x128xf32>
    %47 = vector.shape_cast %46 : vector<1x1x8x128xf32> to vector<8x128xf32>
    %48 = vector.broadcast %45 : f32 to vector<8x128xf32>
    %49 = arith.mulf %48, %47 : vector<8x128xf32>
    %50 = arith.addf %44, %49 : vector<8x128xf32>
    %c1_42 = arith.constant 1 : index
    %c2_43 = arith.constant 2 : index
    %51 = memref.load %arg3[%c1_42, %c2_43] : memref<4x4xf32, #tpu.memory_space<smem>>
    %c0_44 = arith.constant 0 : index
    %c2_45 = arith.constant 2 : index
    %c0_46 = arith.constant 0 : index
    %c0_47 = arith.constant 0 : index
    %52 = vector.load %arg2[%c0_44, %c2_45, %c0_46, %c0_47] : memref<1x4x8x128xf32, #tpu.memory_space<vmem>>, vector<1x1x8x128xf32>
    %53 = vector.shape_cast %52 : vector<1x1x8x128xf32> to vector<8x128xf32>
    %54 = vector.broadcast %51 : f32 to vector<8x128xf32>
    %55 = arith.mulf %54, %53 : vector<8x128xf32>
    %56 = arith.addf %50, %55 : vector<8x128xf32>
    %c1_48 = arith.constant 1 : index
    %c3_49 = arith.constant 3 : index
    %57 = memref.load %arg3[%c1_48, %c3_49] : memref<4x4xf32, #tpu.memory_space<smem>>
    %c0_50 = arith.constant 0 : index
    %c3_51 = arith.constant 3 : index
    %c0_52 = arith.constant 0 : index
    %c0_53 = arith.constant 0 : index
    %58 = vector.load %arg2[%c0_50, %c3_51, %c0_52, %c0_53] : memref<1x4x8x128xf32, #tpu.memory_space<vmem>>, vector<1x1x8x128xf32>
    %59 = vector.shape_cast %58 : vector<1x1x8x128xf32> to vector<8x128xf32>
    %60 = vector.broadcast %57 : f32 to vector<8x128xf32>
    %61 = arith.mulf %60, %59 : vector<8x128xf32>
    %62 = arith.addf %56, %61 : vector<8x128xf32>
    %63 = arith.negf %62 : vector<8x128xf32>
    %64 = math.exp %63 : vector<8x128xf32>
    %cst_54 = arith.constant 1.000000e+00 : f32
    %65 = vector.broadcast %cst_54 : f32 to vector<8x128xf32>
    %66 = arith.addf %65, %64 : vector<8x128xf32>
    %67 = arith.divf %65, %66 : vector<8x128xf32>
    %c0_55 = arith.constant 0 : index
    %c1_56 = arith.constant 1 : index
    %c0_57 = arith.constant 0 : index
    %c0_58 = arith.constant 0 : index
    %68 = vector.load %arg2[%c0_55, %c1_56, %c0_57, %c0_58] : memref<1x4x8x128xf32, #tpu.memory_space<vmem>>, vector<1x1x8x128xf32>
    %69 = vector.shape_cast %68 : vector<1x1x8x128xf32> to vector<8x128xf32>
    %70 = arith.mulf %69, %67 : vector<8x128xf32>
    %c0_59 = arith.constant 0 : index
    %c1_60 = arith.constant 1 : index
    %c0_61 = arith.constant 0 : index
    %c0_62 = arith.constant 0 : index
    %71 = vector.load %arg5[%c0_59, %c1_60, %c0_61, %c0_62] : memref<1x4x8x128xf32, #tpu.memory_space<vmem>>, vector<1x1x8x128xf32>
    %72 = vector.shape_cast %71 : vector<1x1x8x128xf32> to vector<8x128xf32>
    %73 = vector.shape_cast %70 : vector<8x128xf32> to vector<1x1x8x128xf32>
    tpu.vector_store %arg5[%c0_59, %c1_60, %c0_61, %c0_62], %73 {strides = array<i32>} : memref<1x4x8x128xf32, #tpu.memory_space<vmem>>, vector<1x1x8x128xf32>,
    %c2_63 = arith.constant 2 : index
    %74 = memref.load %arg4[%c2_63] : memref<4xf32, #tpu.memory_space<smem>>
    %c2_64 = arith.constant 2 : index
    %c0_65 = arith.constant 0 : index
    %75 = memref.load %arg3[%c2_64, %c0_65] : memref<4x4xf32, #tpu.memory_space<smem>>
    %c0_66 = arith.constant 0 : index
    %c0_67 = arith.constant 0 : index
    %c0_68 = arith.constant 0 : index
    %c0_69 = arith.constant 0 : index
    %76 = vector.load %arg2[%c0_66, %c0_67, %c0_68, %c0_69] : memref<1x4x8x128xf32, #tpu.memory_space<vmem>>, vector<1x1x8x128xf32>
    %77 = vector.shape_cast %76 : vector<1x1x8x128xf32> to vector<8x128xf32>
    %78 = vector.broadcast %75 : f32 to vector<8x128xf32>
    %79 = arith.mulf %78, %77 : vector<8x128xf32>
    %80 = vector.broadcast %74 : f32 to vector<8x128xf32>
    %81 = arith.addf %80, %79 : vector<8x128xf32>
    %c2_70 = arith.constant 2 : index
    %c1_71 = arith.constant 1 : index
    %82 = memref.load %arg3[%c2_70, %c1_71] : memref<4x4xf32, #tpu.memory_space<smem>>
    %c0_72 = arith.constant 0 : index
    %c1_73 = arith.constant 1 : index
    %c0_74 = arith.constant 0 : index
    %c0_75 = arith.constant 0 : index
    %83 = vector.load %arg2[%c0_72, %c1_73, %c0_74, %c0_75] : memref<1x4x8x128xf32, #tpu.memory_space<vmem>>, vector<1x1x8x128xf32>
    %84 = vector.shape_cast %83 : vector<1x1x8x128xf32> to vector<8x128xf32>
    %85 = vector.broadcast %82 : f32 to vector<8x128xf32>
    %86 = arith.mulf %85, %84 : vector<8x128xf32>
    %87 = arith.addf %81, %86 : vector<8x128xf32>
    %c2_76 = arith.constant 2 : index
    %c2_77 = arith.constant 2 : index
    %88 = memref.load %arg3[%c2_76, %c2_77] : memref<4x4xf32, #tpu.memory_space<smem>>
    %c0_78 = arith.constant 0 : index
    %c2_79 = arith.constant 2 : index
    %c0_80 = arith.constant 0 : index
    %c0_81 = arith.constant 0 : index
    %89 = vector.load %arg2[%c0_78, %c2_79, %c0_80, %c0_81] : memref<1x4x8x128xf32, #tpu.memory_space<vmem>>, vector<1x1x8x128xf32>
    %90 = vector.shape_cast %89 : vector<1x1x8x128xf32> to vector<8x128xf32>
    %91 = vector.broadcast %88 : f32 to vector<8x128xf32>
    %92 = arith.mulf %91, %90 : vector<8x128xf32>
    %93 = arith.addf %87, %92 : vector<8x128xf32>
    %c2_82 = arith.constant 2 : index
    %c3_83 = arith.constant 3 : index
    %94 = memref.load %arg3[%c2_82, %c3_83] : memref<4x4xf32, #tpu.memory_space<smem>>
    %c0_84 = arith.constant 0 : index
    %c3_85 = arith.constant 3 : index
    %c0_86 = arith.constant 0 : index
    %c0_87 = arith.constant 0 : index
    %95 = vector.load %arg2[%c0_84, %c3_85, %c0_86, %c0_87] : memref<1x4x8x128xf32, #tpu.memory_space<vmem>>, vector<1x1x8x128xf32>
    %96 = vector.shape_cast %95 : vector<1x1x8x128xf32> to vector<8x128xf32>
    %97 = vector.broadcast %94 : f32 to vector<8x128xf32>
    %98 = arith.mulf %97, %96 : vector<8x128xf32>
    %99 = arith.addf %93, %98 : vector<8x128xf32>
    %100 = arith.negf %99 : vector<8x128xf32>
    %101 = math.exp %100 : vector<8x128xf32>
    %cst_88 = arith.constant 1.000000e+00 : f32
    %102 = vector.broadcast %cst_88 : f32 to vector<8x128xf32>
    %103 = arith.addf %102, %101 : vector<8x128xf32>
    %104 = arith.divf %102, %103 : vector<8x128xf32>
    %c0_89 = arith.constant 0 : index
    %c2_90 = arith.constant 2 : index
    %c0_91 = arith.constant 0 : index
    %c0_92 = arith.constant 0 : index
    %105 = vector.load %arg2[%c0_89, %c2_90, %c0_91, %c0_92] : memref<1x4x8x128xf32, #tpu.memory_space<vmem>>, vector<1x1x8x128xf32>
    %106 = vector.shape_cast %105 : vector<1x1x8x128xf32> to vector<8x128xf32>
    %107 = arith.mulf %106, %104 : vector<8x128xf32>
    %c0_93 = arith.constant 0 : index
    %c2_94 = arith.constant 2 : index
    %c0_95 = arith.constant 0 : index
    %c0_96 = arith.constant 0 : index
    %108 = vector.load %arg5[%c0_93, %c2_94, %c0_95, %c0_96] : memref<1x4x8x128xf32, #tpu.memory_space<vmem>>, vector<1x1x8x128xf32>
    %109 = vector.shape_cast %108 : vector<1x1x8x128xf32> to vector<8x128xf32>
    %110 = vector.shape_cast %107 : vector<8x128xf32> to vector<1x1x8x128xf32>
    tpu.vector_store %arg5[%c0_93, %c2_94, %c0_95, %c0_96], %110 {strides = array<i32>} : memref<1x4x8x128xf32, #tpu.memory_space<vmem>>, vector<1x1x8x128xf32>,
    %c3_97 = arith.constant 3 : index
    %111 = memref.load %arg4[%c3_97] : memref<4xf32, #tpu.memory_space<smem>>
    %c3_98 = arith.constant 3 : index
    %c0_99 = arith.constant 0 : index
    %112 = memref.load %arg3[%c3_98, %c0_99] : memref<4x4xf32, #tpu.memory_space<smem>>
    %c0_100 = arith.constant 0 : index
    %c0_101 = arith.constant 0 : index
    %c0_102 = arith.constant 0 : index
    %c0_103 = arith.constant 0 : index
    %113 = vector.load %arg2[%c0_100, %c0_101, %c0_102, %c0_103] : memref<1x4x8x128xf32, #tpu.memory_space<vmem>>, vector<1x1x8x128xf32>
    %114 = vector.shape_cast %113 : vector<1x1x8x128xf32> to vector<8x128xf32>
    %115 = vector.broadcast %112 : f32 to vector<8x128xf32>
    %116 = arith.mulf %115, %114 : vector<8x128xf32>
    %117 = vector.broadcast %111 : f32 to vector<8x128xf32>
    %118 = arith.addf %117, %116 : vector<8x128xf32>
    %c3_104 = arith.constant 3 : index
    %c1_105 = arith.constant 1 : index
    %119 = memref.load %arg3[%c3_104, %c1_105] : memref<4x4xf32, #tpu.memory_space<smem>>
    %c0_106 = arith.constant 0 : index
    %c1_107 = arith.constant 1 : index
    %c0_108 = arith.constant 0 : index
    %c0_109 = arith.constant 0 : index
    %120 = vector.load %arg2[%c0_106, %c1_107, %c0_108, %c0_109] : memref<1x4x8x128xf32, #tpu.memory_space<vmem>>, vector<1x1x8x128xf32>
    %121 = vector.shape_cast %120 : vector<1x1x8x128xf32> to vector<8x128xf32>
    %122 = vector.broadcast %119 : f32 to vector<8x128xf32>
    %123 = arith.mulf %122, %121 : vector<8x128xf32>
    %124 = arith.addf %118, %123 : vector<8x128xf32>
    %c3_110 = arith.constant 3 : index
    %c2_111 = arith.constant 2 : index
    %125 = memref.load %arg3[%c3_110, %c2_111] : memref<4x4xf32, #tpu.memory_space<smem>>
    %c0_112 = arith.constant 0 : index
    %c2_113 = arith.constant 2 : index
    %c0_114 = arith.constant 0 : index
    %c0_115 = arith.constant 0 : index
    %126 = vector.load %arg2[%c0_112, %c2_113, %c0_114, %c0_115] : memref<1x4x8x128xf32, #tpu.memory_space<vmem>>, vector<1x1x8x128xf32>
    %127 = vector.shape_cast %126 : vector<1x1x8x128xf32> to vector<8x128xf32>
    %128 = vector.broadcast %125 : f32 to vector<8x128xf32>
    %129 = arith.mulf %128, %127 : vector<8x128xf32>
    %130 = arith.addf %124, %129 : vector<8x128xf32>
    %c3_116 = arith.constant 3 : index
    %c3_117 = arith.constant 3 : index
    %131 = memref.load %arg3[%c3_116, %c3_117] : memref<4x4xf32, #tpu.memory_space<smem>>
    %c0_118 = arith.constant 0 : index
    %c3_119 = arith.constant 3 : index
    %c0_120 = arith.constant 0 : index
    %c0_121 = arith.constant 0 : index
    %132 = vector.load %arg2[%c0_118, %c3_119, %c0_120, %c0_121] : memref<1x4x8x128xf32, #tpu.memory_space<vmem>>, vector<1x1x8x128xf32>
    %133 = vector.shape_cast %132 : vector<1x1x8x128xf32> to vector<8x128xf32>
    %134 = vector.broadcast %131 : f32 to vector<8x128xf32>
    %135 = arith.mulf %134, %133 : vector<8x128xf32>
    %136 = arith.addf %130, %135 : vector<8x128xf32>
    %137 = arith.negf %136 : vector<8x128xf32>
    %138 = math.exp %137 : vector<8x128xf32>
    %cst_122 = arith.constant 1.000000e+00 : f32
    %139 = vector.broadcast %cst_122 : f32 to vector<8x128xf32>
    %140 = arith.addf %139, %138 : vector<8x128xf32>
    %141 = arith.divf %139, %140 : vector<8x128xf32>
    %c0_123 = arith.constant 0 : index
    %c3_124 = arith.constant 3 : index
    %c0_125 = arith.constant 0 : index
    %c0_126 = arith.constant 0 : index
    %142 = vector.load %arg2[%c0_123, %c3_124, %c0_125, %c0_126] : memref<1x4x8x128xf32, #tpu.memory_space<vmem>>, vector<1x1x8x128xf32>
    %143 = vector.shape_cast %142 : vector<1x1x8x128xf32> to vector<8x128xf32>
    %144 = arith.mulf %143, %141 : vector<8x128xf32>
    %c0_127 = arith.constant 0 : index
    %c3_128 = arith.constant 3 : index
    %c0_129 = arith.constant 0 : index
    %c0_130 = arith.constant 0 : index
    %145 = vector.load %arg5[%c0_127, %c3_128, %c0_129, %c0_130] : memref<1x4x8x128xf32, #tpu.memory_space<vmem>>, vector<1x1x8x128xf32>
    %146 = vector.shape_cast %145 : vector<1x1x8x128xf32> to vector<8x128xf32>
    %147 = vector.shape_cast %144 : vector<8x128xf32> to vector<1x1x8x128xf32>
    tpu.vector_store %arg5[%c0_127, %c3_128, %c0_129, %c0_130], %147 {strides = array<i32>} : memref<1x4x8x128xf32, #tpu.memory_space<vmem>>, vector<1x1x8x128xf32>,
    return
  }
  func.func @transform_0(%arg0: i32, %arg1: i32) -> (i32, i32, i32, i32) {
    %c0_i32 = arith.constant 0 : i32
    %c0_i32_0 = arith.constant 0 : i32
    %c0_i32_1 = arith.constant 0 : i32
    return %arg0, %c0_i32, %arg1, %c0_i32_0 : i32, i32, i32, i32
  }
  func.func @transform_1(%arg0: i32, %arg1: i32) -> (i32, i32) {
    %c0_i32 = arith.constant 0 : i32
    %c0_i32_0 = arith.constant 0 : i32
    %c0_i32_1 = arith.constant 0 : i32
    return %c0_i32, %c0_i32_0 : i32, i32
  }
  func.func @transform_2(%arg0: i32, %arg1: i32) -> i32 {
    %c0_i32 = arith.constant 0 : i32
    %c0_i32_0 = arith.constant 0 : i32
    return %c0_i32 : i32
  }
  func.func @transform_3(%arg0: i32, %arg1: i32) -> (i32, i32, i32, i32) {
    %c0_i32 = arith.constant 0 : i32
    %c0_i32_0 = arith.constant 0 : i32
    %c0_i32_1 = arith.constant 0 : i32
    return %arg0, %c0_i32, %arg1, %c0_i32_0 : i32, i32, i32, i32
  }
}

</mosaic_0001>

<bundles_post_ra>
// kernel: tpu_custom_call.1
= control target key start
LH: loop header
LB: loop body
LE: loop exit
PB: predicated region body
PF: predicated region fallthrough
CT: control target
= control target key end

     0   :  { %s1035_s0 = inlined_call_operand.hbm [shape: f32[2,4,8,128], index: 0, kind: input, shape index: {}]   ;;  %s1036_s1 = inlined_call_operand.hbm [shape: f32[4,4], index: 1, kind: input, shape index: {}]   ;;  %s1037_s2 = inlined_call_operand.vmem [shape: f32[4], index: 2, kind: input, shape index: {}]   ;;  %s1038_s3 = inlined_call_operand.hbm [shape: f32[2,4,8,128], index: 3, kind: output, shape index: {}]  }
   0x1   :  { %1040 = sst [smem:[#allocation14_spill]] %s1036_s1 }
   0x2   :  { %8 = vsyncpa [#allocation3], 0 }
   0x3   :  { %10 = vsyncpa [#allocation3 + $0x1], 0 }
   0x4   :  { %11 = vsyncpa [#allocation5], 0 }
   0x5   :  { %12 = vsyncpa [#allocation6], 0 }
   0x6   :  { %13 = vsyncpa [#allocation4], 0 }
   0x7   :  { %15 = vsyncpa [#allocation4 + $0x1], 0  ;;  %s814_s12 = smov 0   ;;  %s816_s13 = smov 0  }
   0x8   :  { %s818_s14 = smov 0   ;;  %s820_s15 = smov 0  }
   0x9   :  { %s822_s16 = smov 0   ;;  %s824_s17 = smov 0  }
   0xa LB: > { %s481_s18 = sadd.s32 4294967295, %s784_s17   ;;  %s482_s19 = sadd.s32 4294967294, %s784_s17   ;;  %s784_s17 = sphi %s824_s17, %s21_s17   ;;  %s780_s16 = sphi %s822_s16, %s1056_s16   ;;  %s776_s15 = sphi %s820_s15, %s1055_s15   ;;  %s772_s14 = sphi %s818_s14, %s1054_s14   ;;  %s768_s13 = sphi %s816_s13, %s1053_s13   ;;  %s764_s12 = sphi %s814_s12, %s1052_s12  }
   0xb   : > { %s42_s20 = sadd.s32 1, %s772_s14  ;;  %p49_p0 = scmp.ne.s32.totalorder %s772_s14, %s768_s13 }
   0xc   : > { %p50_p1 = scmp.eq.s32.totalorder %s784_s17, 0  ;;  %p55_p2 = scmp.ne.s32.totalorder %s768_s13, %s764_s12 }
   0xd   : > { %p852_p3 = scmp.eq.s32.totalorder %s481_s18, 0  ;;  %p123_p4 = scmp.eq.s32.totalorder %s481_s18, 1 }
   0xe   : > { %p51_p5 = por %p50_p1, %p49_p0  ;;  %p129_p6 = scmp.eq.s32.totalorder %s482_s19, 1 }
   0xf   : > { %p858_p7 = por %p852_p3, %p55_p2  ;;  %p862_p8 = por %p123_p4, %p49_p0 }
  0x10   : > { %p866_p9 = por %p129_p6, %p55_p2  ;;  %p483_p10 = scmp.ge.s32.totalorder %s784_s17, 1 }
  0x11   : > { %s1043_s23 = scalar_select %p862_p8, 1, 0 }
  0x12   : > { %s1044_s24 = scalar_select %p866_p9, 1, 0 }
  0x13   : > { %p136_p11 = scmp.lt.s32.totalorder %s784_s17, 3  ;;  %p568_p1 = scmp.lt.s32.totalorder %s784_s17, 2 }
  0x14   : > { %s158_s28 = sshll.u32 %s1037_s2, 4  ;;  %s169_s4 = sand.u32 1, %s772_s14   ;;  %s159_s28 = int_to_ptr.vmem [resolvable:$true] %s158_s28 }
  0x15   : > { %p873_p13 = pnand %p483_p10, %p136_p11  ;;  %p883_p4 = pnand %p568_p1, %p51_p5 }
  0x16   : > { %s33_s5 = sadd.s32 1, %s780_s16  ;;  %s786_s6 = smov [#allocation7]  }
  0x17   : > { %p551_p0 = pneg %p873_p13  ;;  %s1048_s1 = sld [smem:[#allocation14_spill]] }
  0x18   : > { %s653_s9 = scalar_lea.vmem %s159_s28, 16  ;;  %p661_p1 = scmp.lt.s32.totalorder %s159_s28, %s159_s28 }
  0x19   : > { %p889_p2 = pnand %p551_p0, %p852_p3  ;;  %p654_p5 = scmp.ne.s32.totalorder %s159_s28, %s653_s9 }
  0x1a   : > { %p662_p0 = scmp.lt.s32.totalorder %s653_s9, %s653_s9 }
  0x1b   : > { %p655_p6 = pneg %p889_p2 }
  0x1c   : > { %p663_p12 = por %p662_p0, %p661_p1 }
  0x1d   : > { %554 = dma.hbm_to_smem (!%p889_p2), %s1048_s1, 64, %s786_s6, [#allocation5]  }
  0x1e   : > { %p656_p10 = pnand %p655_p6, %p654_p5 }
  0x20   : > { %p657_p11 = pneg %p656_p10 }
  0x22   : > { %p664_p9 = pnand %p663_p12, %p657_p11 }
  0x24   : > { %667 = shalt.err (!%p664_p9)
}
  0x25   : > { %s787_s10 = smov [#allocation8]   ;;  %p35_p8 = scmp.ge.s32.totalorder %s33_s5, 2 }
  0x26   : > { %557 = dma.vmem_to_smem (!%p889_p2), %s159_s28, 16, %s787_s10, [#allocation6]  }
  0x27   : > { %s487_s11 = sshll.u32 %s169_s4, 5  ;;  %s537_s18 = sshll.u32 %s780_s16, 9 }
  0x28   : > { %s1058_s5 = smov (%p35_p8, %s33_s5), 0  ;;  %s180_s27 = scalar_lea.hbm %s1035_s0, %s537_s18 }
  0x29   : > { %s37_s6 = ssub.s32 %s780_s16, %s1058_s5  ;;  %s173_s7 = scalar_lea.vmem [#allocation2], %s487_s11 }
  0x2a   : > { %s181_s8 = sshll.u32 %s173_s7, 4  ;;  %p40_p9 = scmp.eq.s32.totalorder %s37_s6, 0  ;;  %s182_s8 = int_to_ptr.vmem [resolvable:$true] %s181_s8 }
  0x2b   : > { %s170_s9 = scalar_lea.sflag [#allocation3], %s169_s4  ;;  %p670_p12 = pneg %p883_p4 }
  0x2c   : > { %s915_s30 = scalar_select %p40_p9, %s772_s14, %s42_s20  }
  0x2d   : > { %s681_s28 = scalar_lea.vmem %s182_s8, 512  ;;  %s788_s10 = smov [#allocation2]  }
  0x2e   : > { %p682_p2 = scmp.ne.s32.totalorder %s182_s8, %s681_s28  ;;  %s686_s1 = sshll.u32 %s788_s10, 4  ;;  %s687_s1 = int_to_ptr.vmem [resolvable:$false] %s686_s1 }
  0x2f   : > { %s688_s19 = scalar_lea.vmem %s687_s1, 1024  ;;  %p689_p6 = scmp.lt.s32.totalorder %s182_s8, %s687_s1 }
  0x30   : > { %p684_p8 = pnand %p682_p2, %p670_p12  ;;  %p690_p10 = scmp.lt.s32.totalorder %s688_s19, %s681_s28 }
  0x32   : > { %p685_p5 = pneg %p684_p8  ;;  %p691_p11 = por %p690_p10, %p689_p6 }
  0x34   : > { %p692_p1 = pnand %p691_p11, %p685_p5 }
  0x36   : > { %695 = shalt.err (!%p692_p1)
}
  0x37   : > { %s789_s11 = smov 128   ;;  %s790_s20 = smov 8  }
  0x38   : > { %561 = dma.hbm_to_vmem [thread:$0]  (!%p883_p4), %s180_s27, 512, %s182_s8, %s170_s9, %s789_s11, %s789_s11, %s790_s20  }
  0x39   : > { %193 = sbr.rel (%p873_p13) target bundleno = 150 (0x96), region = 32  ;;  %s924_s4 = sand.u32 (!%p873_p13), 1, %s768_s13  }
  0x3a   : > { %s491_s1 = sshll.u32 (!%p873_p13), %s924_s4, 5  ;;  %s196_s18 = scalar_lea.sflag (!%p873_p13), [#allocation3], %s924_s4 }
  0x3b   : > { %s199_s26 = scalar_lea.vmem (!%p873_p13), [#allocation2], %s491_s1 }
  0x3e   : > { %747 = dma.done.wait (%p858_p7), %s196_s18, 512  }
  0x3f   : > { %749 = vsyncadd (%p858_p7), %s196_s18, 4294966784 }
  0x40   : > { %751 = dma.done.wait (%p852_p3), [#allocation5], 64  }
  0x41   : > { %753 = vsyncadd (%p852_p3), [#allocation5], 4294967232 }
  0x42   : > { %755 = dma.done.wait (%p852_p3), [#allocation6], 16  }
  0x43   : > { %757 = vsyncadd (%p852_p3), [#allocation6], 4294967280 }
  0x44   : > { %212 = sfence }
  0x45   : > { %s231_s25 = sld [smem:[#allocation8]]  ;;  %v942_v0 = vld [vmem:[%s199_s26] sm:$0xff]  ;;  %v946_v1 = vld [vmem:[%s199_s26 + $0x8] sm:$0xff]  ;;  %v948_v4 = vld [vmem:[%s199_s26 + $0x10] sm:$0xff]  ;;  %p1049_p7 = scmp.ne.s32.totalorder %s1043_s23, 0 }
  0x46   : > { %s232_s29 = sld [smem:[#allocation7]]  ;;  %v952_v9 = vld [vmem:[%s199_s26 + $0x18] sm:$0xff] }
  0x47   : > { %s495_s27 = sld [smem:[#allocation7 + $0x1]] }
  0x48   : > { %s497_s6 = sld [smem:[#allocation7 + $0x2]] }
  0x49   : > { %s499_s7 = sld [smem:[#allocation7 + $0x3]] }
  0x4a   : > { %s944_s22 = sld [smem:[#allocation8 + $0x1]] }
  0x4b   : > { %s503_s8 = sld [smem:[#allocation7 + $0x80]]  ;;  %v236_v3 = vstv %s231_s25 }
  0x4c   : > { %v234_v2 = vstv %s232_s29  ;;  %s504_s9 = sld [smem:[#allocation7 + $0x81]] }
  0x4d   : > { %v235_v5 = vmul.f32 %v234_v2, %v942_v0  ;;  %v241_v6 = vstv %s495_s27  ;;  %s506_s21 = sld [smem:[#allocation7 + $0x82]] }
  0x4e   : > { %v242_v7 = vmul.f32 %v946_v1, %v241_v6  ;;  %v247_v8 = vstv %s497_s6  ;;  %s508_s28 = sld [smem:[#allocation7 + $0x83]] }
  0x4f   : > { %v237_v10 = vadd.f32 %v236_v3, %v235_v5  ;;  %v248_v11 = vmul.f32 %v948_v4, %v247_v8  ;;  %v253_v12 = vstv %s499_s7  ;;  %s955_s10 = sld [smem:[#allocation8 + $0x2]]  ;;  %s230_s7 = scalar_lea.vmem [#allocation9], %s491_s1 }
  0x50   : > { %s513_s19 = sld [smem:[#allocation7 + $0x100]]  ;;  %v254_v14 = vmul.f32 %v952_v9, %v253_v12  ;;  %v269_v16 = vstv %s944_s22  ;;  %s372_s22 = sshll.u32 %s230_s7, 4  ;;  %s981_s22 = int_to_ptr.vmem [resolvable:$true] %s372_s22 }
  0x51   : > { %v243_v13 = vadd.f32 %v242_v7, %v237_v10  ;;  %v267_v15 = vstv %s503_s8  ;;  %s514_s11 = sld [smem:[#allocation7 + $0x101]]  ;;  %s538_s8 = sshll.u32 %s776_s15, 9 }
  0x52   : > { %v268_v17 = vmul.f32 %v267_v15, %v942_v0  ;;  %v273_v18 = vstv %s504_s9  ;;  %s516_s20 = sld [smem:[#allocation7 + $0x102]]  ;;  %s791_s15 = smov [#allocation9]  }
  0x53   : > { %v249_v19 = vadd.f32 %v248_v11, %v243_v13  ;;  %v274_v20 = vmul.f32 %v946_v1, %v273_v18  ;;  %v278_v21 = vstv %s506_s21  ;;  %s518_s18 = sld [smem:[#allocation7 + $0x103]]  ;;  %s986_s21 = scalar_lea.hbm %s1038_s3, %s538_s8 }
  0x54   : > { %v270_v22 = vadd.f32 %v269_v16, %v268_v17  ;;  %v279_v23 = vmul.f32 %v948_v4, %v278_v21  ;;  %v283_v24 = vstv %s508_s28  ;;  %s962_s26 = sld [smem:[#allocation8 + $0x3]]  ;;  %s358_s28 = scalar_lea.sflag [#allocation4], %s924_s4 }
  0x55   : > { %v255_v25 = vadd.f32 %v254_v14, %v249_v19  ;;  %s523_s25 = sld [smem:[#allocation7 + $0x180]]  ;;  %v284_v27 = vmul.f32 %v952_v9, %v283_v24  ;;  %v300_v29 = vstv %s955_s10  ;;  %s696_s10 = scalar_lea.vmem %s981_s22, 512 }
  0x56   : > { %v275_v26 = vadd.f32 %v274_v20, %v270_v22  ;;  %v298_v28 = vstv %s513_s19  ;;  %s524_s29 = sld [smem:[#allocation7 + $0x181]]  ;;  %p697_p3 = scmp.ne.s32.totalorder %s981_s22, %s696_s10 }
  0x57   : > { %v501_v30 = vmul.f32 -1.442695, %v255_v25  ;;  %v299_v31 = vmul.f32 %v298_v28, %v942_v0  ;;  %v304_v32 = vstv %s514_s11  ;;  %s526_s27 = sld [smem:[#allocation7 + $0x182]]  ;;  %s700_s19 = sshll.u32 %s791_s15, 4  ;;  %s701_s19 = int_to_ptr.vmem [resolvable:$false] %s700_s19 }
  0x58   : > { %v280_v33 = vadd.f32 %v279_v23, %v275_v26  ;;  %v305_v34 = vmul.f32 %v946_v1, %v304_v32  ;;  %v309_v35 = vstv %s516_s20  ;;  %s528_s6 = sld [smem:[#allocation7 + $0x183]]  ;;  %p698_p13 = pnand %p697_p3, %p1049_p7 }
  0x59   : > { %626 = vpow2.f32 %v501_v30  ;;  %v301_v36 = vadd.f32 %v300_v29, %v299_v31  ;;  %v310_v37 = vmul.f32 %v948_v4, %v309_v35  ;;  %v314_v38 = vstv %s518_s18  ;;  %s702_s11 = scalar_lea.vmem %s701_s19, 1024  ;;  %p703_p0 = scmp.lt.s32.totalorder %s981_s22, %s701_s19 }
  0x5a   : > { %v285_v39 = vadd.f32 %v284_v27, %v280_v33  ;;  %v315_v41 = vmul.f32 %v952_v9, %v314_v38  ;;  %v331_v43 = vstv %s962_s26  ;;  %p699_p4 = pneg %p698_p13  ;;  %p704_p9 = scmp.lt.s32.totalorder %s702_s11, %s696_s10 }
  0x5b   : > { %v306_v40 = vadd.f32 %v305_v34, %v301_v36  ;;  %v329_v42 = vstv %s523_s25 }
  0x5c   : > { %v510_v44 = vmul.f32 -1.442695, %v285_v39  ;;  %v330_v45 = vmul.f32 %v329_v42, %v942_v0  ;;  %v335_v46 = vstv %s524_s29  ;;  %p705_p12 = por %p704_p9, %p703_p0 }
  0x5d   : > { %v311_v47 = vadd.f32 %v310_v37, %v306_v40  ;;  %v336_v48 = vmul.f32 %v946_v1, %v335_v46  ;;  %v340_v49 = vstv %s526_s27 }
  0x5e   : > { %628 = vpow2.f32 %v510_v44  ;;  %v332_v50 = vadd.f32 %v331_v43, %v330_v45  ;;  %v341_v51 = vmul.f32 %v948_v4, %v340_v49  ;;  %v345_v52 = vstv %s528_s6  ;;  %p706_p2 = pnand %p705_p12, %p699_p4 }
  0x5f   : > { %v316_v53 = vadd.f32 %v315_v41, %v311_v47  ;;  %v346_v55 = vmul.f32 %v952_v9, %v345_v52 }
  0x60   : > { %v337_v54 = vadd.f32 %v336_v48, %v332_v50 }
  0x61   : > { %v520_v56 = vmul.f32 -1.442695, %v316_v53 }
  0x62   : > { %v342_v57 = vadd.f32 %v341_v51, %v337_v54 }
  0x63   : > { %630 = vpow2.f32 %v520_v56 }
  0x64   : > { %v347_v58 = vadd.f32 %v346_v55, %v342_v57 }
  0x66   : > { %v627_v59 = vpop.eup %626  ;;  %v530_v60 = vmul.f32 -1.442695, %v347_v58 }
  0x67   : > { %v259_v61 = vadd.f32 1.0, %v627_v59 }
  0x68   : > { %632 = vpow2.f32 %v530_v60 }
  0x69   : > { %634 = vrcp.f32 %v259_v61 }
  0x6b   : > { %v629_v62 = vpop.eup %628 }
  0x6c   : > { %v289_v63 = vadd.f32 1.0, %v629_v62 }
  0x6e   : > { %636 = vrcp.f32 %v289_v63 }
  0x70   : > { %v631_v2 = vpop.eup %630 }
  0x71   : > { %v320_v3 = vadd.f32 1.0, %v631_v2 }
  0x73   : > { %638 = vrcp.f32 %v320_v3 }
  0x75   : > { %v633_v5 = vpop.eup %632 }
  0x76   : > { %v635_v6 = vpop.eup %634  ;;  %v351_v7 = vadd.f32 1.0, %v633_v5 }
  0x77   : > { %v262_v8 = vmul.f32 %v635_v6, %v942_v0 }
  0x78   : > { %640 = vrcp.f32 %v351_v7 }
  0x79   : > { %263 = vst [vmem:[%s230_s7] sm:$0xff] %v262_v8 }
  0x7b   : > { %v637_v10 = vpop.eup %636 }
  0x7c   : > { %v292_v11 = vmul.f32 %v637_v10, %v946_v1 }
  0x7e   : > { %511 = vst [vmem:[%s230_s7 + $0x8] sm:$0xff] %v292_v11 }
  0x80   : > { %v639_v12 = vpop.eup %638 }
  0x81   : > { %v323_v13 = vmul.f32 %v639_v12, %v948_v4 }
  0x83   : > { %521 = vst [vmem:[%s230_s7 + $0x10] sm:$0xff] %v323_v13 }
  0x85   : > { %v641_v0 = vpop.eup %640 }
  0x86   : > { %v354_v1 = vmul.f32 %v641_v0, %v952_v9 }
  0x88   : > { %531 = vst [vmem:[%s230_s7 + $0x18] sm:$0xff] %v354_v1 }
  0x89   : > { %709 = shalt.err (!%p706_p2)
}
  0x8a   : > { %s710_s20 = scalar_lea.hbm %s986_s21, 512  ;;  %s714_s25 = scalar_lea.hbm %s1038_s3, 1024 }
  0x8b   : > { %p711_p8 = scmp.ne.s32.totalorder %s986_s21, %s710_s20  ;;  %p715_p10 = scmp.lt.s32.totalorder %s986_s21, %s1038_s3 }
  0x8c   : > { %p716_p11 = scmp.lt.s32.totalorder %s714_s25, %s710_s20 }
  0x8d   : > { %p712_p5 = pnand %p711_p8, %p1049_p7 }
  0x8e   : > { %p717_p1 = por %p716_p11, %p715_p10 }
  0x8f   : > { %p713_p6 = pneg %p712_p5 }
  0x91   : > { %p718_p3 = pnand %p717_p1, %p713_p6 }
  0x93   : > { %721 = shalt.err (!%p718_p3)
}
  0x94   : > { %s792_s6 = smov 128   ;;  %s793_s7 = smov 8  }
  0x95   : > { %549 = dma.vmem_to_hbm [thread:$0]  (%p1049_p7), %s981_s22, 512, %s986_s21, %s358_s28, %s792_s6, %s792_s6, %s793_s7  }
  0x96 PF: > { %s387_s8 = sand.u32 1, %s764_s12   ;;  %p1050_p13 = scmp.ne.s32.totalorder %s1044_s24, 0 }
  0x97   : > { %p1051_p4 = scmp.ge.s32.totalorder %s784_s17, 2  ;;  %s388_s9 = scalar_lea.sflag [#allocation4], %s387_s8 }
  0x99   : > { %p563_p0 = pnand %p1051_p4, %p1050_p13 }
  0x9b   : > { %p564_p9 = pneg %p563_p0 }
  0x9d   : > { %759 = dma.done.wait (%p564_p9), %s388_s9, 512  }
  0x9e   : > { %761 = vsyncadd (%p564_p9), %s388_s9, 4294966784  ;;  %s21_s17 = sadd.s32 1, %s784_s17   ;;  %s1052_s12 = smov %s768_s13 }
  0x9f   : > { %p18_p12 = scmp.ge.s32.totalorder %s21_s17, 4   ;;  %s1053_s13 = smov %s772_s14 }
  0xa0   : > { %s1054_s14 = smov %s915_s30  ;;  %s1055_s15 = smov %s780_s16 }
  0xa1   : > { %s1056_s16 = smov %s1058_s5  ;;  %20 = sbr.rel (!%p18_p12) target bundleno = 10 (0xa), region = 93 }
  0xa6   :  { %393 = vsyncpa [#allocation3], 1 }
  0xa7   :  { %395 = vsyncpa [#allocation3 + $0x1], 1 }
  0xa8   :  { %396 = vsyncpa [#allocation4], 1 }
  0xa9   :  { %398 = vsyncpa [#allocation4 + $0x1], 1 }
  0xaa   :  { %399 = vsyncpa [#allocation5], 1 }
  0xab   :  { %401 = vsyncpa [#allocation5 + $0x1], 1 }
  0xac   :  { %402 = vsyncpa [#allocation6], 1 }
  0xad   :  { %404 = vsyncpa [#allocation6 + $0x1], 1 }

</bundles_post_ra>
